<compile_context>
chip_gen: v7x
topology: tpu7x:2x2x1
jax: 0.10.0
libtpu: 0.0.40
codegen_flags: <defaults>
</compile_context>

<pallas_src>
import math
import functools

import jax
import jax.numpy as jnp
from jax.experimental import pallas as pl
from jax.experimental.pallas import tpu as pltpu

BN_EPS = 1e-5
NUM_CLASSES = 1000

STAGE_CFG = (  # (num_blocks, cin_first, cout, downsample_first)
    (3, 64, 256, False),
    (4, 256, 512, True),
    (23, 512, 1024, True),
    (3, 1024, 2048, True),
)


def _round_up(x, m):
    return (x + m - 1) // m * m


def _pick_tile(dim, candidates):
    """Largest candidate tile that divides the (already aligned) dim."""
    for c in candidates:
        if c <= dim and dim % c == 0:
            return c
    return dim


@functools.lru_cache(maxsize=1)
def _vmem_limit_bytes():
    """Chip-aware scoped VMEM budget (v5e/v6e: 128 MiB phys, v7x: 64 MiB)."""
    cap = 64 * 1024 * 1024
    try:
        cap = int(pltpu.get_tpu_info().vmem_capacity_bytes)
    except Exception:  # fall back to the conservative (v7x) assumption
        pass
    return max(32 * 1024 * 1024, min(cap * 3 // 4, 100 * 1024 * 1024))


@functools.lru_cache(maxsize=1)
def _tm_candidates():
    # Bigger M tiles when there is >=128 MiB of VMEM (v5e / v6e); v7x keeps a
    # smaller cap so the double-buffered working set stays well under 64 MiB.
    if _vmem_limit_bytes() >= 64 * 1024 * 1024:
        return (1024, 512, 256, 128, 64, 32, 16, 8)
    return (512, 256, 128, 64, 32, 16, 8)


def _row_tile(hw):
    """Row-block for (N, HW, C) elementwise kernels. Full-extent if HW % 8 != 0."""
    if hw % 8 == 0:
        return _pick_tile(hw, (2048, 1024, 512, 448, 256, 128, 64, 32, 16, 8))
    return hw  # full array extent along that axis -> no 8-alignment required


# --------------------------- matmul (conv / linear) ---------------------------

def _mm_kernel_single(x_ref, w_ref, b_ref, o_ref, *, act):
    """Whole K fits in one block: write the output tile exactly once."""
    y = jnp.dot(x_ref[...], w_ref[...], preferred_element_type=jnp.float32)
    y = y + b_ref[...]
    if act == "relu":
        y = jnp.maximum(y, 0.0)
    elif act == "sigmoid":
        y = jax.nn.sigmoid(y)
    o_ref[...] = y.astype(o_ref.dtype)


def _mm_kernel_multi(x_ref, w_ref, b_ref, o_ref, acc_ref, *, act):
    """Accumulate in f32 VMEM scratch; cast + store bf16 on the last k step."""
    k = pl.program_id(2)

    @pl.when(k == 0)
    def _():
        acc_ref[...] = jnp.zeros_like(acc_ref)

    acc_ref[...] += jnp.dot(x_ref[...], w_ref[...],
                            preferred_element_type=jnp.float32)

    @pl.when(k == pl.num_programs(2) - 1)
    def _():
        y = acc_ref[...] + b_ref[...]
        if act == "relu":
            y = jnp.maximum(y, 0.0)
        elif act == "sigmoid":
            y = jax.nn.sigmoid(y)
        o_ref[...] = y.astype(o_ref.dtype)


def matmul_bias_act(x, w, bias, *, act, out_dtype=jnp.bfloat16):
    """act(x @ w + bias).

    x: (M, K); w: (Kp, Np) bf16 pre-padded; bias: (1, Np) f32 pre-padded.
    Returns the padded (Mp, Np) result (bf16 by default); caller slices.
    """
    M, K = x.shape
    Kp, Np = w.shape

    Mp = _round_up(max(M, 8), 8)
    tm = _pick_tile(Mp, _tm_candidates())
    tk = _pick_tile(Kp, (512, 384, 256, 128))
    tn = _pick_tile(Np, (1024, 512, 384, 256, 128))

    # Megacore (v7x): guarantee >= 2 blocks on a "parallel" axis when possible.
    if (Mp // tm) * (Np // tn) == 1:
        if Np >= 256 and (Np // 2) % 128 == 0:
            tn = Np // 2
        elif Mp >= 16 and (Mp // 2) % 8 == 0:
            tm = Mp // 2

    # Skip the pad/cast copy when the activation is already aligned bf16.
    if x.dtype == jnp.bfloat16 and M == Mp and K == Kp:
        xp = x
    else:
        xp = jnp.zeros((Mp, Kp), jnp.bfloat16).at[:M, :K].set(
            x.astype(jnp.bfloat16))

    nk = Kp // tk
    vmem = _vmem_limit_bytes()

    if nk == 1:
        return pl.pallas_call(
            functools.partial(_mm_kernel_single, act=act),
            out_shape=jax.ShapeDtypeStruct((Mp, Np), out_dtype),
            grid_spec=pltpu.PrefetchScalarGridSpec(
                num_scalar_prefetch=0,
                grid=(Mp // tm, Np // tn),
                in_specs=[
                    pl.BlockSpec((tm, Kp), lambda i, j: (i, 0)),
                    pl.BlockSpec((Kp, tn), lambda i, j: (0, j)),
                    pl.BlockSpec((1, tn), lambda i, j: (0, j)),
                ],
                out_specs=pl.BlockSpec((tm, tn), lambda i, j: (i, j)),
            ),
            compiler_params=pltpu.CompilerParams(
                dimension_semantics=("parallel", "parallel"),
                vmem_limit_bytes=vmem),
        )(xp, w, bias)

    return pl.pallas_call(
        functools.partial(_mm_kernel_multi, act=act),
        out_shape=jax.ShapeDtypeStruct((Mp, Np), out_dtype),
        grid_spec=pltpu.PrefetchScalarGridSpec(
            num_scalar_prefetch=0,
            grid=(Mp // tm, Np // tn, nk),
            in_specs=[
                pl.BlockSpec((tm, tk), lambda i, j, k: (i, k)),
                pl.BlockSpec((tk, tn), lambda i, j, k: (k, j)),
                pl.BlockSpec((1, tn), lambda i, j, k: (0, j)),
            ],
            out_specs=pl.BlockSpec((tm, tn), lambda i, j, k: (i, j)),
            scratch_shapes=[pltpu.VMEM((tm, tn), jnp.float32)],
        ),
        compiler_params=pltpu.CompilerParams(
            dimension_semantics=("parallel", "parallel", "arbitrary"),
            vmem_limit_bytes=vmem),
    )(xp, w, bias)


# --------------------------- SE squeeze + excitation (fused) ------------------

def _se_squeeze_excite_kernel(u_ref, w1_ref, w2_ref, s_ref, acc_ref, *, inv_hw):
    k = pl.program_id(1)

    @pl.when(k == 0)
    def _():
        acc_ref[...] = jnp.zeros_like(acc_ref)

    # accumulate channel sums over this HW block (f32)
    acc_ref[...] += jnp.sum(u_ref[...].astype(jnp.float32), axis=1)

    @pl.when(k == pl.num_programs(1) - 1)
    def _():
        C = acc_ref.shape[1]
        z = (acc_ref[...] * inv_hw).astype(jnp.bfloat16)        # (1, C)
        z8 = jnp.broadcast_to(z, (8, C))                        # MXU-friendly M
        h = jnp.dot(z8, w1_ref[...], preferred_element_type=jnp.float32)
        h = jnp.maximum(h, 0.0).astype(jnp.bfloat16)
        y = jnp.dot(h, w2_ref[...], preferred_element_type=jnp.float32)
        s = jax.nn.sigmoid(y)                                   # (8, C), rows equal
        s_ref[...] = s[0:1].reshape(s_ref.shape)


def se_squeeze_excite(u, w1, w2):
    """sigmoid(relu(mean_HW(u) @ w1) @ w2) -> (N, 1, C) f32 scale.

    u: (N, HW, C) bf16; w1: (C, Crp) bf16; w2: (Crp, C) bf16 (zero-padded rows
    of w2 / cols of w1 contribute nothing).
    """
    N, HW, C = u.shape
    R = _row_tile(HW)
    Crp = w1.shape[1]
    return pl.pallas_call(
        functools.partial(_se_squeeze_excite_kernel, inv_hw=1.0 / HW),
        out_shape=jax.ShapeDtypeStruct((N, 1, C), jnp.float32),
        grid_spec=pltpu.PrefetchScalarGridSpec(
            num_scalar_prefetch=0,
            grid=(N, HW // R),
            in_specs=[
                pl.BlockSpec((1, R, C), lambda n, k: (n, k, 0)),
                pl.BlockSpec((C, Crp), lambda n, k: (0, 0)),
                pl.BlockSpec((Crp, C), lambda n, k: (0, 0)),
            ],
            out_specs=pl.BlockSpec((1, 1, C), lambda n, k: (n, 0, 0)),
            scratch_shapes=[pltpu.VMEM((1, C), jnp.float32)],
        ),
        compiler_params=pltpu.CompilerParams(
            dimension_semantics=("parallel", "arbitrary"),
            vmem_limit_bytes=_vmem_limit_bytes()),
    )(u, w1, w2)


# --------------------------- SE scale * u + identity, relu --------------------

def _se_apply_kernel(u_ref, s_ref, id_ref, o_ref):
    y = (u_ref[...].astype(jnp.float32) * s_ref[...]
         + id_ref[...].astype(jnp.float32))
    o_ref[...] = jnp.maximum(y, 0.0).astype(o_ref.dtype)


def se_scale_add_relu(u, s, identity):
    """relu(u * s + identity); u,identity:(N,HW,C) bf16, s:(N,1,C) f32 -> bf16."""
    N, HW, C = u.shape
    R = _row_tile(HW)
    return pl.pallas_call(
        _se_apply_kernel,
        out_shape=jax.ShapeDtypeStruct((N, HW, C), jnp.bfloat16),
        grid_spec=pltpu.PrefetchScalarGridSpec(
            num_scalar_prefetch=0,
            grid=(N, HW // R),
            in_specs=[pl.BlockSpec((1, R, C), lambda n, k: (n, k, 0)),
                      pl.BlockSpec((1, 1, C), lambda n, k: (n, 0, 0)),
                      pl.BlockSpec((1, R, C), lambda n, k: (n, k, 0))],
            out_specs=pl.BlockSpec((1, R, C), lambda n, k: (n, k, 0)),
        ),
        compiler_params=pltpu.CompilerParams(
            dimension_semantics=("parallel", "parallel"),
            vmem_limit_bytes=_vmem_limit_bytes()),
    )(u, s, identity)


# --------------------------- global average pool (head) -----------------------

def _avgpool_kernel(u_ref, o_ref, *, inv_hw):
    k = pl.program_id(1)

    @pl.when(k == 0)
    def _():
        o_ref[...] = jnp.zeros_like(o_ref)

    o_ref[...] += jnp.sum(u_ref[...].astype(jnp.float32), axis=1,
                          keepdims=True) * inv_hw


def global_avg_pool(u):
    """u: (N, HW, C) -> (N, C) f32 mean over HW (AdaptiveAvgPool2d(1))."""
    N, HW, C = u.shape
    R = _row_tile(HW)
    out = pl.pallas_call(
        functools.partial(_avgpool_kernel, inv_hw=1.0 / HW),
        out_shape=jax.ShapeDtypeStruct((N, 1, C), jnp.float32),
        grid_spec=pltpu.PrefetchScalarGridSpec(
            num_scalar_prefetch=0,
            grid=(N, HW // R),
            in_specs=[pl.BlockSpec((1, R, C), lambda n, k: (n, k, 0))],
            out_specs=pl.BlockSpec((1, 1, C), lambda n, k: (n, 0, 0)),
        ),
        compiler_params=pltpu.CompilerParams(
            dimension_semantics=("parallel", "arbitrary"),
            vmem_limit_bytes=_vmem_limit_bytes()),
    )(u)
    return out.reshape(N, C)


# --------------------------- max pool / im2col glue ---------------------------

def maxpool_3x3_s2(x):
    """MaxPool2d(kernel=3, stride=2, padding=1) on NHWC (bf16).

    TODO(synk): left as fused XLA strided-slice running max (no 9x HBM stack);
    a dedicated Pallas kernel was a net HBM loss at these shapes.
    """
    N, H, W, C = x.shape
    Ho = (H + 2 - 3) // 2 + 1
    Wo = (W + 2 - 3) // 2 + 1
    xp = jnp.pad(x, ((0, 0), (1, 1), (1, 1), (0, 0)),
                 constant_values=float("-inf"))
    out = None
    for di in range(3):
        for dj in range(3):
            v = xp[:, di:di + 2 * Ho:2, dj:dj + 2 * Wo:2, :]
            out = v if out is None else jnp.maximum(out, v)
    return out


def im2col(x, k, stride, pad):
    """Build bf16 im2col patches (no-op copy for 1x1 stride-1 bf16 convs)."""
    x = x.astype(jnp.bfloat16)
    N, H, W, C = x.shape
    Ho = (H + 2 * pad - k) // stride + 1
    Wo = (W + 2 * pad - k) // stride + 1
    if pad > 0:
        x = jnp.pad(x, ((0, 0), (pad, pad), (pad, pad), (0, 0)))
    cols = [x[:, di:di + stride * Ho:stride, dj:dj + stride * Wo:stride, :]
            for di in range(k) for dj in range(k)]
    patches = jnp.concatenate(cols, axis=-1) if len(cols) > 1 else cols[0]
    return patches.reshape(N * Ho * Wo, k * k * C), Ho, Wo


def conv_bn_act(x, w, bias, *, k, stride, pad, act, cout):
    N = x.shape[0]
    cols, Ho, Wo = im2col(x, k, stride, pad)
    y = matmul_bias_act(cols, w, bias, act=act)          # bf16
    return y[:N * Ho * Wo, :cout].reshape(N, Ho, Wo, cout)


# --------------------------- parameter init -----------------------------------

def init_conv_bn(key, cin, cout, k):
    # Conv (bias=False) kaiming_normal_(fan_out, relu) + BN(gamma=1, beta=0,
    # mean=0, var=1, eval). BN scale folded into the weight; stored pre-padded.
    std = math.sqrt(2.0 / (cout * k * k))
    w = std * jax.random.normal(key, (k * k * cin, cout), jnp.float32)
    scale = 1.0 / math.sqrt(1.0 + BN_EPS)
    w = w * scale
    bias = jnp.zeros((cout,), jnp.float32)

    K = k * k * cin
    Kp = _round_up(K, 128)
    Np = _round_up(cout, 128)
    wp = jnp.zeros((Kp, Np), jnp.bfloat16).at[:K, :cout].set(w.astype(jnp.bfloat16))
    bp = jnp.zeros((1, Np), jnp.float32).at[:, :cout].set(bias[None, :])
    return {"w": wp, "bias": bp}


def init_linear(key, fin, fout):
    bound = 1.0 / math.sqrt(fin)
    kw, kb = jax.random.split(key)
    w = jax.random.uniform(kw, (fin, fout), jnp.float32, -bound, bound)
    b = jax.random.uniform(kb, (1, fout), jnp.float32, -bound, bound)
    Kp = _round_up(fin, 128)
    Np = _round_up(fout, 128)
    wp = jnp.zeros((Kp, Np), jnp.bfloat16).at[:fin, :fout].set(w.astype(jnp.bfloat16))
    bp = jnp.zeros((1, Np), jnp.float32).at[:, :fout].set(b)
    return {"w": wp, "b": bp}


def init_se_linear(key, fin, fout):
    bound = 1.0 / math.sqrt(fin)
    w = jax.random.uniform(key, (fin, fout), jnp.float32, -bound, bound)
    wp = jnp.zeros((_round_up(fin, 128), _round_up(fout, 128)),
                   jnp.bfloat16).at[:fin, :fout].set(w.astype(jnp.bfloat16))
    return wp


def init_se_module(key, cin, cout, reduction_ratio=16):
    keys = jax.random.split(key, 6)
    mid = cout // 4
    p = {
        "c1": init_conv_bn(keys[0], cin, mid, 1),
        "c2": init_conv_bn(keys[1], mid, mid, 3),
        "c3": init_conv_bn(keys[2], mid, cout, 1),
        "fc1_w": init_se_linear(keys[3], cout, cout // reduction_ratio),
        "fc2_w": init_se_linear(keys[4], cout // reduction_ratio, cout),
    }
    if cin != cout:
        p["sc"] = init_conv_bn(keys[5], cin, cout, 1)
    return p


def init_seresnet101(key):
    keys = iter(jax.random.split(key, 64))
    params = {"conv1": init_conv_bn(next(keys), 3, 64, 7)}
    stages = []
    for (n, cin, cout, _down) in STAGE_CFG:
        blocks = [init_se_module(next(keys), cin, cout)]
        for _ in range(n - 1):
            blocks.append(init_se_module(next(keys), cout, cout))
        stages.append(blocks)
    params["stages"] = stages
    params["fc"] = init_linear(next(keys), 2048, NUM_CLASSES)
    return params


# --------------------------- model forward ------------------------------------

@jax.jit
def _stem_forward(x_nchw, p):
    x = jnp.transpose(x_nchw, (0, 2, 3, 1)).astype(jnp.float32)  # NCHW -> NHWC
    x = conv_bn_act(x, p["w"], p["bias"], k=7, stride=2, pad=3,
                    act="relu", cout=64)
    return maxpool_3x3_s2(x)


@functools.partial(jax.jit, static_argnames=("stride", "mid", "cout"))
def se_module_forward(x, p, *, stride, mid, cout):
    N = x.shape[0]
    assert ("sc" in p) or stride == 1  # identity path must match spatial size

    # residual branch: conv1x1 -> conv3x3(stride) -> conv1x1 (no act)
    u = conv_bn_act(x, p["c1"]["w"], p["c1"]["bias"], k=1, stride=1, pad=0,
                    act="relu", cout=mid)
    u = conv_bn_act(u, p["c2"]["w"], p["c2"]["bias"], k=3, stride=stride, pad=1,
                    act="relu", cout=mid)
    u = conv_bn_act(u, p["c3"]["w"], p["c3"]["bias"], k=1, stride=1, pad=0,
                    act="none", cout=cout)
    _, Ho, Wo, Co = u.shape
    u_flat = u.reshape(N, Ho * Wo, Co)

    # fused squeeze (avg pool over HW) + excitation (fc1+relu+fc2+sigmoid)
    s = se_squeeze_excite(u_flat, p["fc1_w"], p["fc2_w"])       # (N, 1, Co) f32

    # shortcut
    if "sc" in p:
        identity = conv_bn_act(x, p["sc"]["w"], p["sc"]["bias"], k=1,
                               stride=stride, pad=0, act="none", cout=cout)
    else:
        identity = x
    id_flat = identity.reshape(N, Ho * Wo, Co)

    out = se_scale_add_relu(u_flat, s, id_flat)                 # bf16
    return out.reshape(N, Ho, Wo, Co)


@jax.jit
def _head_forward(x, fc):
    N, H, W, C = x.shape
    z = global_avg_pool(x.reshape(N, H * W, C))                 # (N, 2048) f32
    logits = matmul_bias_act(z, fc["w"], fc["b"], act="none",
                             out_dtype=jnp.float32)
    return logits[:N, :NUM_CLASSES]


def seresnet101_forward(params, x_nchw):
    x = _stem_forward(x_nchw, params["conv1"])
    for stage_params, (_n, _cin, cout, down) in zip(params["stages"], STAGE_CFG):
        for bi, blk in enumerate(stage_params):
            stride = 2 if (down and bi == 0) else 1
            x = se_module_forward(x, blk, stride=stride, mid=cout // 4,
                                  cout=cout)
    return _head_forward(x, params["fc"])


# --------------------------- main ----------------------------------------------

if __name__ == "__main__":
    key = jax.random.PRNGKey(0)
    pkey, xkey = jax.random.split(key)
    params = init_seresnet101(pkey)

    # Small, architecture-consistent input (NCHW like the PyTorch module).
    x = jax.random.normal(xkey, (2, 3, 32, 32), jnp.float32)

    out = seresnet101_forward(params, x)
    out = jax.block_until_ready(out)
    assert out.shape == (2, NUM_CLASSES), out.shape
    assert bool(jnp.all(jnp.isfinite(out)))
    print("KERNEL_OK")
</pallas_src>

<mosaic_0001>
module attributes {stable_mosaic.version = 11 : i64} {
  func.func @_mm_kernel_single(%arg0: i32, %arg1: i32, %arg2: memref<256x256xbf16, #tpu.memory_space<vmem>>, %arg3: memref<256x128xbf16, #tpu.memory_space<vmem>>, %arg4: memref<1x128xf32, #tpu.memory_space<vmem>>, %arg5: memref<256x128xbf16, #tpu.memory_space<vmem>>) attributes {dimension_semantics = [#tpu.dimension_semantics<parallel>, #tpu.dimension_semantics<parallel>], iteration_bounds = array<i64: 2, 1>, scalar_prefetch = 0 : i64, scratch_operands = 0 : i64, tpu.core_type = #tpu.core_type<tc>, window_params = [{transform_indices = @transform_0, window_bounds = array<i64: 256, 256>}, {transform_indices = @transform_1, window_bounds = array<i64: 256, 128>}, {transform_indices = @transform_2, window_bounds = array<i64: 1, 128>}, {transform_indices = @transform_3, window_bounds = array<i64: 256, 128>}]} {
    %c0 = arith.constant 0 : index
    %c0_0 = arith.constant 0 : index
    %0 = vector.load %arg2[%c0, %c0_0] : memref<256x256xbf16, #tpu.memory_space<vmem>>, vector<256x256xbf16>
    %c0_1 = arith.constant 0 : index
    %c0_2 = arith.constant 0 : index
    %1 = vector.load %arg3[%c0_1, %c0_2] : memref<256x128xbf16, #tpu.memory_space<vmem>>, vector<256x128xbf16>
    %cst = arith.constant dense<0.000000e+00> : vector<256x128xf32>
    %2 = tpu.matmul %0, %1, %cst {dimension_numbers = #tpu.dot_dimension_numbers<[1], [0], [0], [1], [0, 0, 1, 1], [], []>} : vector<256x256xbf16>, vector<256x128xbf16>, vector<256x128xf32> -> vector<256x128xf32>
    %c0_3 = arith.constant 0 : index
    %c0_4 = arith.constant 0 : index
    %3 = vector.load %arg4[%c0_3, %c0_4] : memref<1x128xf32, #tpu.memory_space<vmem>>, vector<1x128xf32>
    %4 = vector.broadcast %3 : vector<1x128xf32> to vector<256x128xf32>
    %5 = arith.addf %2, %4 : vector<256x128xf32>
    %cst_5 = arith.constant 0.000000e+00 : f32
    %6 = vector.broadcast %cst_5 : f32 to vector<256x128xf32>
    %7 = arith.maximumf %5, %6 : vector<256x128xf32>
    %8 = arith.truncf %7 : vector<256x128xf32> to vector<256x128xbf16>
    %c0_6 = arith.constant 0 : index
    %c0_7 = arith.constant 0 : index
    %9 = vector.load %arg5[%c0_6, %c0_7] : memref<256x128xbf16, #tpu.memory_space<vmem>>, vector<256x128xbf16>
    tpu.vector_store %arg5[%c0_6, %c0_7], %8 {strides = array<i32>} : memref<256x128xbf16, #tpu.memory_space<vmem>>, vector<256x128xbf16>,
    return
  }
  func.func @transform_0(%arg0: i32, %arg1: i32) -> (i32, i32) {
    %c0_i32 = arith.constant 0 : i32
    %c0_i32_0 = arith.constant 0 : i32
    return %arg0, %c0_i32 : i32, i32
  }
  func.func @transform_1(%arg0: i32, %arg1: i32) -> (i32, i32) {
    %c0_i32 = arith.constant 0 : i32
    %c0_i32_0 = arith.constant 0 : i32
    return %c0_i32, %arg1 : i32, i32
  }
  func.func @transform_2(%arg0: i32, %arg1: i32) -> (i32, i32) {
    %c0_i32 = arith.constant 0 : i32
    %c0_i32_0 = arith.constant 0 : i32
    return %c0_i32, %arg1 : i32, i32
  }
  func.func @transform_3(%arg0: i32, %arg1: i32) -> (i32, i32) {
    %c0_i32 = arith.constant 0 : i32
    return %arg0, %arg1 : i32, i32
  }
}

</mosaic_0001>

<bundles_post_ra>
// kernel: _stem_forward.1
= control target key start
LH: loop header
LB: loop body
LE: loop exit
PB: predicated region body
PF: predicated region fallthrough
CT: control target
= control target key end

     0   :  { %s1494_s12 = smov 0   ;;  %s1496_s13 = smov 0   ;;  %s1668_s0 = inlined_call_operand.vmem [shape: bf16[512,256], index: 0, kind: input, shape index: {}]   ;;  %s1669_s1 = inlined_call_operand.vmem [shape: bf16[256,128], index: 1, kind: input, shape index: {}]   ;;  %s1670_s2 = inlined_call_operand.vmem [shape: f32[1,128], index: 2, kind: input, shape index: {}]   ;;  %s1671_s3 = inlined_call_operand.vmem [shape: bf16[512,128], index: 3, kind: output, shape index: {}]  }
   0x1   :  { %s1498_s14 = smov 0  }
   0x2 LB: > { %s25_s15 = sadd.s32 1, %s1468_s13  ;;  %p1017_p0 = scmp.ge.s32.totalorder %s1472_s14, 1  ;;  %s1472_s14 = sphi %s1498_s14, %s13_s14   ;;  %s1468_s13 = sphi %s1496_s13, %s1673_s13   ;;  %s1464_s12 = sphi %s1494_s12, %s1672_s12  }
   0x3   : > { %p27_p1 = scmp.ge.s32.totalorder %s25_s15, 2  ;;  %p170_p2 = scmp.lt.s32.totalorder %s1472_s14, 3 }
   0x5   : > { %s1675_s15 = smov (%p27_p1, %s25_s15), 0  ;;  %p171_p3 = pnand %p1017_p0, %p170_p2 }
   0x6   : > { %v1386_v0 = vld [vmem:[%s1669_s1 + $0x40] sm:$0xff] (!%p171_p3)   ;;  %s1018_s18 = sshll.u32 (!%p171_p3), %s1464_s12, 5  ;;  %v1388_v2 = vld [vmem:[%s1669_s1 + $0x48] sm:$0xff] (!%p171_p3)   ;;  %v1390_v4 = vld [vmem:[%s1669_s1 + $0x50] sm:$0xff] (!%p171_p3)  }
   0x7   : > { %174 = sbr.rel (%p171_p3) target bundleno = 320 (0x140), region = 32  ;;  %v1387_v1 = vld [vmem:[%s1669_s1] sm:$0xff] (!%p171_p3)   ;;  %1234 = vmatprep.subr.bf16.mxu0 (!%p171_p3), %v1386_v0  ;;  %1346 = vmatprep.subr.bf16.mxu1 (!%p171_p3), %v1386_v0  ;;  %v1389_v3 = vld [vmem:[%s1669_s1 + $0x8] sm:$0xff] (!%p171_p3)   ;;  %p206_p4 = scmp.lt.s32.totalorder (!%p171_p3), %s1018_s18, 63  ;;  %v1391_v5 = vld [vmem:[%s1669_s1 + $0x10] sm:$0xff] (!%p171_p3)  }
   0x8   : > { %1235 = vmatpush3.bf16.msra.mxu0 (!%p171_p3), %v1387_v1  ;;  %1354 = vmatpush3.bf16.msra.mxu1 (!%p171_p3), %v1387_v1  ;;  %v1392_v6 = vld [vmem:[%s1669_s1 + $0x58] sm:$0xff] (!%p171_p3)   ;;  %v1394_v8 = vld [vmem:[%s1669_s1 + $0x60] sm:$0xff] (!%p171_p3)   ;;  %v1396_v10 = vld [vmem:[%s1669_s1 + $0x68] sm:$0xff] (!%p171_p3)  }
   0x9   : > { %1236 = vmatprep.subr.bf16.mxu0 (!%p171_p3), %v1388_v2  ;;  %1347 = vmatprep.subr.bf16.mxu1 (!%p171_p3), %v1388_v2  ;;  %v1393_v7 = vld [vmem:[%s1669_s1 + $0x18] sm:$0xff] (!%p171_p3)   ;;  %v1395_v9 = vld [vmem:[%s1669_s1 + $0x20] sm:$0xff] (!%p171_p3)   ;;  %v1397_v13 = vld [vmem:[%s1669_s1 + $0x28] sm:$0xff] (!%p171_p3)  }
   0xa   : > { %v1398_v14 = vld [vmem:[%s1669_s1 + $0x70] sm:$0xff] (!%p171_p3)   ;;  %v1400_v16 = vld [vmem:[%s1669_s1 + $0x78] sm:$0xff] (!%p171_p3)   ;;  %v1603_v50 = vld [vmem:[%s1670_s2] ss:$0 sm:$0xff] (!%p171_p3) }
   0xb   : > { %v1399_v15 = vld [vmem:[%s1669_s1 + $0x30] sm:$0xff] (!%p171_p3)   ;;  %v1401_v17 = vld [vmem:[%s1669_s1 + $0x38] sm:$0xff] (!%p171_p3)  }
   0xc   : > { %1237 = vmatpush3.bf16.msra.mxu0 (!%p171_p3), %v1389_v3  ;;  %1355 = vmatpush3.bf16.msra.mxu1 (!%p171_p3), %v1389_v3 }
   0xd   : > { %1238 = vmatprep.subr.bf16.mxu0 (!%p171_p3), %v1390_v4  ;;  %1348 = vmatprep.subr.bf16.mxu1 (!%p171_p3), %v1390_v4 }
   0xe   : > { %s1677_s18 = smov (!%p206_p4, %s1018_s18), 63 }
   0xf   : > { %s1106_s6 = sshll.u32 %s1677_s18, 3  ;;  %s1022_s5 = sshll.u32 %s1677_s18, 2 }
  0x10   : > { %1239 = vmatpush3.bf16.msra.mxu0 %v1391_v5  ;;  %1356 = vmatpush3.bf16.msra.mxu1 %v1391_v5  ;;  %s1545_s11 = scalar_lea.vmem %s1668_s0, %s1106_s6  ;;  %s1613_s8 = scalar_lea.vmem %s1671_s3, %s1022_s5 }
  0x11   : > { %1240 = vmatprep.subr.bf16.mxu0 %v1392_v6  ;;  %1349 = vmatprep.subr.bf16.mxu1 %v1392_v6  ;;  %v1404_v11 = vld [vmem:[%s1545_s11 + $0x4] ss:$8 sps:$4 sm:$0xff]   ;;  %v1402_v18 = vld [vmem:[%s1545_s11] ss:$8 sps:$4 sm:$0xff]   ;;  %v1408_v20 = vld [vmem:[%s1545_s11 + $0x14] ss:$8 sps:$4 sm:$0xff]  }
  0x12   : > { %v1407_v12 = vld [vmem:[%s1545_s11 + $0x84] ss:$8 sps:$4 sm:$0xff]   ;;  %588 = vmatprep.mubr.bf16.mxu0 %v1404_v11  ;;  %v1405_v19 = vld [vmem:[%s1545_s11 + $0x80] ss:$8 sps:$4 sm:$0xff]   ;;  %v1410_v21 = vld [vmem:[%s1545_s11 + $0x94] ss:$8 sps:$4 sm:$0xff]  }
  0x13   : > { %652 = vmatprep.mubr.bf16.mxu1 %v1407_v12  ;;  %v1412_v22 = vld [vmem:[%s1545_s11 + $0x10] ss:$8 sps:$4 sm:$0xff]   ;;  %v1414_v24 = vld [vmem:[%s1545_s11 + $0x24] ss:$8 sps:$4 sm:$0xff]   ;;  %v1418_v26 = vld [vmem:[%s1545_s11 + $0x20] ss:$8 sps:$4 sm:$0xff]  }
  0x14   : > { %1241 = vmatpush3.bf16.msra.mxu0 %v1393_v7  ;;  %1357 = vmatpush3.bf16.msra.mxu1 %v1393_v7  ;;  %v1413_v23 = vld [vmem:[%s1545_s11 + $0x90] ss:$8 sps:$4 sm:$0xff]   ;;  %v1416_v25 = vld [vmem:[%s1545_s11 + $0xa4] ss:$8 sps:$4 sm:$0xff]   ;;  %v1419_v27 = vld [vmem:[%s1545_s11 + $0xa0] ss:$8 sps:$4 sm:$0xff]  }
  0x15   : > { %1242 = vmatprep.subr.bf16.mxu0 %v1394_v8  ;;  %1350 = vmatprep.subr.bf16.mxu1 %v1394_v8  ;;  %v1420_v28 = vld [vmem:[%s1545_s11 + $0x34] ss:$8 sps:$4 sm:$0xff]   ;;  %v1424_v30 = vld [vmem:[%s1545_s11 + $0x30] ss:$8 sps:$4 sm:$0xff]   ;;  %v1426_v32 = vld [vmem:[%s1545_s11 + $0x44] ss:$8 sps:$4 sm:$0xff]  }
  0x16   : > { %v1422_v29 = vld [vmem:[%s1545_s11 + $0xb4] ss:$8 sps:$4 sm:$0xff]   ;;  %v1425_v31 = vld [vmem:[%s1545_s11 + $0xb0] ss:$8 sps:$4 sm:$0xff]   ;;  %v1428_v33 = vld [vmem:[%s1545_s11 + $0xc4] ss:$8 sps:$4 sm:$0xff]  }
  0x17   : > { %v1430_v34 = vld [vmem:[%s1545_s11 + $0x40] ss:$8 sps:$4 sm:$0xff]   ;;  %v1432_v36 = vld [vmem:[%s1545_s11 + $0x54] ss:$8 sps:$4 sm:$0xff]   ;;  %v1436_v38 = vld [vmem:[%s1545_s11 + $0x50] ss:$8 sps:$4 sm:$0xff]  }
  0x18   : > { %1243 = vmatpush3.bf16.msra.mxu0 %v1395_v9  ;;  %1358 = vmatpush3.bf16.msra.mxu1 %v1395_v9  ;;  %v1431_v35 = vld [vmem:[%s1545_s11 + $0xc0] ss:$8 sps:$4 sm:$0xff]   ;;  %v1434_v37 = vld [vmem:[%s1545_s11 + $0xd4] ss:$8 sps:$4 sm:$0xff]   ;;  %v1437_v39 = vld [vmem:[%s1545_s11 + $0xd0] ss:$8 sps:$4 sm:$0xff]  }
  0x19   : > { %1244 = vmatprep.subr.bf16.mxu0 %v1396_v10  ;;  %1351 = vmatprep.subr.bf16.mxu1 %v1396_v10  ;;  %v1438_v40 = vld [vmem:[%s1545_s11 + $0x64] ss:$8 sps:$4 sm:$0xff]   ;;  %v1442_v42 = vld [vmem:[%s1545_s11 + $0x60] ss:$8 sps:$4 sm:$0xff]   ;;  %v1444_v44 = vld [vmem:[%s1545_s11 + $0x74] ss:$8 sps:$4 sm:$0xff]  }
  0x1a   : > { %v1440_v41 = vld [vmem:[%s1545_s11 + $0xe4] ss:$8 sps:$4 sm:$0xff]   ;;  %v1443_v43 = vld [vmem:[%s1545_s11 + $0xe0] ss:$8 sps:$4 sm:$0xff]   ;;  %v1446_v45 = vld [vmem:[%s1545_s11 + $0xf4] ss:$8 sps:$4 sm:$0xff]  }
  0x1b   : > { %v1448_v46 = vld [vmem:[%s1545_s11 + $0x70] ss:$8 sps:$4 sm:$0xff]  }
  0x1c   : > { %1245 = vmatpush3.bf16.msra.mxu0 %v1397_v13  ;;  %1359 = vmatpush3.bf16.msra.mxu1 %v1397_v13  ;;  %v1449_v47 = vld [vmem:[%s1545_s11 + $0xf0] ss:$8 sps:$4 sm:$0xff]  }
  0x1d   : > { %1246 = vmatprep.subr.bf16.mxu0 %v1398_v14  ;;  %1352 = vmatprep.subr.bf16.mxu1 %v1398_v14 }
  0x20   : > { %1247 = vmatpush3.bf16.msra.mxu0 %v1399_v15  ;;  %1360 = vmatpush3.bf16.msra.mxu1 %v1399_v15 }
  0x21   : > { %1248 = vmatprep.subr.bf16.mxu0 %v1400_v16  ;;  %1353 = vmatprep.subr.bf16.mxu1 %v1400_v16 }
  0x24   : > { %1249 = vmatpush3.bf16.msra.mxu0 %v1401_v17  ;;  %1361 = vmatpush3.bf16.msra.mxu1 %v1401_v17 }
  0x27   : > { %589 = vmatmul.mubr.bf16.vlgmr.msra.gmra.mrb[0].mxu0 %v1402_v18  ;;  %653 = vmatmul.mubr.bf16.vlgmr.msra.gmra.mrb[0].mxu1 %v1405_v19 }
  0x28   : > { %596 = vmatprep.mubr.bf16.mxu0 %v1408_v20  ;;  %660 = vmatprep.mubr.bf16.mxu1 %v1410_v21 }
  0x2f   : > { %597 = vmatmul.mubr.bf16.gmra.mrb[4].mxu0 %v1412_v22  ;;  %661 = vmatmul.mubr.bf16.gmra.mrb[4].mxu1 %v1413_v23 }
  0x30   : > { %604 = vmatprep.mubr.bf16.mxu0 %v1414_v24  ;;  %668 = vmatprep.mubr.bf16.mxu1 %v1416_v25 }
  0x37   : > { %605 = vmatmul.mubr.bf16.gmra.mrb[8].mxu0 %v1418_v26  ;;  %669 = vmatmul.mubr.bf16.gmra.mrb[8].mxu1 %v1419_v27 }
  0x38   : > { %612 = vmatprep.mubr.bf16.mxu0 %v1420_v28  ;;  %676 = vmatprep.mubr.bf16.mxu1 %v1422_v29 }
  0x3f   : > { %613 = vmatmul.mubr.bf16.gmra.mrb[12].mxu0 %v1424_v30  ;;  %677 = vmatmul.mubr.bf16.gmra.mrb[12].mxu1 %v1425_v31 }
  0x40   : > { %620 = vmatprep.mubr.bf16.mxu0 %v1426_v32  ;;  %684 = vmatprep.mubr.bf16.mxu1 %v1428_v33 }
  0x47   : > { %621 = vmatmul.mubr.bf16.gmra.mrb[16].mxu0 %v1430_v34  ;;  %685 = vmatmul.mubr.bf16.gmra.mrb[16].mxu1 %v1431_v35 }
  0x48   : > { %628 = vmatprep.mubr.bf16.mxu0 %v1432_v36  ;;  %692 = vmatprep.mubr.bf16.mxu1 %v1434_v37 }
  0x4f   : > { %629 = vmatmul.mubr.bf16.gmra.mrb[20].mxu0 %v1436_v38  ;;  %693 = vmatmul.mubr.bf16.gmra.mrb[20].mxu1 %v1437_v39 }
  0x50   : > { %636 = vmatprep.mubr.bf16.mxu0 %v1438_v40  ;;  %700 = vmatprep.mubr.bf16.mxu1 %v1440_v41 }
  0x57   : > { %637 = vmatmul.mubr.bf16.gmra.mrb[24].mxu0 %v1442_v42  ;;  %701 = vmatmul.mubr.bf16.gmra.mrb[24].mxu1 %v1443_v43 }
  0x58   : > { %644 = vmatprep.mubr.bf16.mxu0 %v1444_v44  ;;  %708 = vmatprep.mubr.bf16.mxu1 %v1446_v45 }
  0x5f   : > { %645 = vmatmul.mubr.bf16.gmra.mrb[28].mxu0 %v1448_v46  ;;  %709 = vmatmul.mubr.bf16.gmra.mrb[28].mxu1 %v1449_v47 }
  0xfa   : > { %v1250_v48 = vpop.f32.mrb[0].mxu0  ;;  %v1298_v49 = vpop.f32.mrb[0].mxu1 }
  0xfb   : > { %v1251_v51 = vpop.f32.mrb[1].mxu0  ;;  %v1299_v52 = vpop.f32.mrb[1].mxu1 }
  0xfc   : > { %v1252_v53 = vadd.f32 %v1251_v51, %v1250_v48  ;;  %v1300_v54 = vadd.f32 %v1299_v52, %v1298_v49  ;;  %v1253_v55 = vpop.f32.mrb[2].mxu0  ;;  %v1301_v56 = vpop.f32.mrb[2].mxu1 }
  0xfd   : > { %v1254_v57 = vpop.f32.mrb[3].mxu0  ;;  %v1302_v58 = vpop.f32.mrb[3].mxu1 }
  0xfe   : > { %v591_v59 = vadd.f32 %v1252_v53, %v1603_v50  ;;  %v655_v60 = vadd.f32 %v1300_v54, %v1603_v50  ;;  %v1255_v61 = vadd.f32 %v1254_v57, %v1253_v55  ;;  %v1303_v62 = vadd.f32 %v1302_v58, %v1301_v56 }
 0x100   : > { %v594_v63 = vadd.f32 %v1255_v61, %v1603_v50  ;;  %v658_v0 = vadd.f32 %v1303_v62, %v1603_v50  ;;  %v717_v1 = vmax.f32 %v591_v59, 0.0  ;;  %v733_v2 = vmax.f32 %v655_v60, 0.0 }
 0x102   : > { %v718_v3 = vmax.f32 %v594_v63, 0.0  ;;  %v734_v4 = vmax.f32 %v658_v0, 0.0  ;;  %v1256_v5 = vpop.f32.mrb[4].mxu0  ;;  %v1304_v6 = vpop.f32.mrb[4].mxu1 }
 0x103   : > { %v1257_v7 = vpop.f32.mrb[5].mxu0  ;;  %v1305_v8 = vpop.f32.mrb[5].mxu1 }
 0x104   : > { %v1142_v9 = vpack.c.bf16 %v718_v3, %v717_v1  ;;  %v1182_v10 = vpack.c.bf16 %v734_v4, %v733_v2  ;;  %v1258_v11 = vadd.f32 %v1257_v7, %v1256_v5  ;;  %v1306_v12 = vadd.f32 %v1305_v8, %v1304_v6  ;;  %v1259_v13 = vpop.f32.mrb[6].mxu0  ;;  %v1307_v14 = vpop.f32.mrb[6].mxu1 }
 0x105   : > { %v1260_v15 = vpop.f32.mrb[7].mxu0  ;;  %v1308_v16 = vpop.f32.mrb[7].mxu1 }
 0x106   : > { %1143 = vst [vmem:[%s1613_s8] sm:$0xff] %v1142_v9   ;;  %1226 = vst [vmem:[%s1613_s8 + $0x40] sm:$0xff] %v1182_v10   ;;  %v599_v17 = vadd.f32 %v1258_v11, %v1603_v50  ;;  %v663_v18 = vadd.f32 %v1306_v12, %v1603_v50  ;;  %v1261_v19 = vadd.f32 %v1260_v15, %v1259_v13 }
 0x107   : > { %v1309_v20 = vadd.f32 %v1308_v16, %v1307_v14 }
 0x108   : > { %v602_v21 = vadd.f32 %v1261_v19, %v1603_v50  ;;  %v719_v23 = vmax.f32 %v599_v17, 0.0  ;;  %v735_v24 = vmax.f32 %v663_v18, 0.0 }
 0x109   : > { %v666_v22 = vadd.f32 %v1309_v20, %v1603_v50 }
 0x10a   : > { %v720_v25 = vmax.f32 %v602_v21, 0.0  ;;  %v1262_v27 = vpop.f32.mrb[8].mxu0  ;;  %v1310_v28 = vpop.f32.mrb[8].mxu1 }
 0x10b   : > { %v736_v26 = vmax.f32 %v666_v22, 0.0  ;;  %v1263_v29 = vpop.f32.mrb[9].mxu0  ;;  %v1311_v30 = vpop.f32.mrb[9].mxu1 }
 0x10c   : > { %v1147_v31 = vpack.c.bf16 %v720_v25, %v719_v23  ;;  %v1264_v33 = vadd.f32 %v1263_v29, %v1262_v27  ;;  %v1312_v34 = vadd.f32 %v1311_v30, %v1310_v28  ;;  %v1265_v35 = vpop.f32.mrb[10].mxu0  ;;  %v1313_v36 = vpop.f32.mrb[10].mxu1 }
 0x10d   : > { %v1187_v32 = vpack.c.bf16 %v736_v26, %v735_v24  ;;  %v1266_v37 = vpop.f32.mrb[11].mxu0  ;;  %v1314_v38 = vpop.f32.mrb[11].mxu1 }
 0x10e   : > { %1219 = vst [vmem:[%s1613_s8 + $0x8] sm:$0xff] %v1147_v31   ;;  %v607_v39 = vadd.f32 %v1264_v33, %v1603_v50  ;;  %v671_v40 = vadd.f32 %v1312_v34, %v1603_v50  ;;  %v1267_v41 = vadd.f32 %v1266_v37, %v1265_v35  ;;  %v1315_v42 = vadd.f32 %v1314_v38, %v1313_v36 }
 0x10f   : > { %1227 = vst [vmem:[%s1613_s8 + $0x48] sm:$0xff] %v1187_v32  }
 0x110   : > { %v610_v43 = vadd.f32 %v1267_v41, %v1603_v50  ;;  %v674_v44 = vadd.f32 %v1315_v42, %v1603_v50  ;;  %v721_v45 = vmax.f32 %v607_v39, 0.0  ;;  %v737_v46 = vmax.f32 %v671_v40, 0.0 }
 0x112   : > { %v722_v47 = vmax.f32 %v610_v43, 0.0  ;;  %v738_v48 = vmax.f32 %v674_v44, 0.0  ;;  %v1268_v49 = vpop.f32.mrb[12].mxu0  ;;  %v1316_v51 = vpop.f32.mrb[12].mxu1 }
 0x113   : > { %v1269_v52 = vpop.f32.mrb[13].mxu0  ;;  %v1317_v53 = vpop.f32.mrb[13].mxu1 }
 0x114   : > { %v1152_v54 = vpack.c.bf16 %v722_v47, %v721_v45  ;;  %v1192_v55 = vpack.c.bf16 %v738_v48, %v737_v46  ;;  %v1270_v56 = vadd.f32 %v1269_v52, %v1268_v49  ;;  %v1318_v57 = vadd.f32 %v1317_v53, %v1316_v51  ;;  %v1271_v58 = vpop.f32.mrb[14].mxu0  ;;  %v1319_v59 = vpop.f32.mrb[14].mxu1 }
 0x115   : > { %v1272_v60 = vpop.f32.mrb[15].mxu0  ;;  %v1320_v61 = vpop.f32.mrb[15].mxu1 }
 0x116   : > { %1220 = vst [vmem:[%s1613_s8 + $0x10] sm:$0xff] %v1152_v54   ;;  %1228 = vst [vmem:[%s1613_s8 + $0x50] sm:$0xff] %v1192_v55   ;;  %v615_v62 = vadd.f32 %v1270_v56, %v1603_v50  ;;  %v679_v63 = vadd.f32 %v1318_v57, %v1603_v50  ;;  %v1273_v0 = vadd.f32 %v1272_v60, %v1271_v58 }
 0x117   : > { %v1321_v1 = vadd.f32 %v1320_v61, %v1319_v59 }
 0x118   : > { %v618_v2 = vadd.f32 %v1273_v0, %v1603_v50  ;;  %v723_v4 = vmax.f32 %v615_v62, 0.0  ;;  %v739_v5 = vmax.f32 %v679_v63, 0.0 }
 0x119   : > { %v682_v3 = vadd.f32 %v1321_v1, %v1603_v50 }
 0x11a   : > { %v724_v6 = vmax.f32 %v618_v2, 0.0  ;;  %v1274_v8 = vpop.f32.mrb[16].mxu0  ;;  %v1322_v9 = vpop.f32.mrb[16].mxu1 }
 0x11b   : > { %v740_v7 = vmax.f32 %v682_v3, 0.0  ;;  %v1275_v10 = vpop.f32.mrb[17].mxu0  ;;  %v1323_v11 = vpop.f32.mrb[17].mxu1 }
 0x11c   : > { %v1157_v12 = vpack.c.bf16 %v724_v6, %v723_v4  ;;  %v1276_v14 = vadd.f32 %v1275_v10, %v1274_v8  ;;  %v1324_v15 = vadd.f32 %v1323_v11, %v1322_v9  ;;  %v1277_v16 = vpop.f32.mrb[18].mxu0  ;;  %v1325_v17 = vpop.f32.mrb[18].mxu1 }
 0x11d   : > { %v1197_v13 = vpack.c.bf16 %v740_v7, %v739_v5  ;;  %v1278_v18 = vpop.f32.mrb[19].mxu0  ;;  %v1326_v19 = vpop.f32.mrb[19].mxu1 }
 0x11e   : > { %1221 = vst [vmem:[%s1613_s8 + $0x18] sm:$0xff] %v1157_v12   ;;  %v623_v20 = vadd.f32 %v1276_v14, %v1603_v50  ;;  %v687_v21 = vadd.f32 %v1324_v15, %v1603_v50  ;;  %v1279_v22 = vadd.f32 %v1278_v18, %v1277_v16  ;;  %v1327_v23 = vadd.f32 %v1326_v19, %v1325_v17 }
 0x11f   : > { %1229 = vst [vmem:[%s1613_s8 + $0x58] sm:$0xff] %v1197_v13  }
 0x120   : > { %v626_v24 = vadd.f32 %v1279_v22, %v1603_v50  ;;  %v690_v25 = vadd.f32 %v1327_v23, %v1603_v50  ;;  %v725_v26 = vmax.f32 %v623_v20, 0.0  ;;  %v741_v27 = vmax.f32 %v687_v21, 0.0 }
 0x122   : > { %v726_v28 = vmax.f32 %v626_v24, 0.0  ;;  %v742_v29 = vmax.f32 %v690_v25, 0.0  ;;  %v1280_v30 = vpop.f32.mrb[20].mxu0  ;;  %v1328_v31 = vpop.f32.mrb[20].mxu1 }
 0x123   : > { %v1281_v32 = vpop.f32.mrb[21].mxu0  ;;  %v1329_v33 = vpop.f32.mrb[21].mxu1 }
 0x124   : > { %v1162_v34 = vpack.c.bf16 %v726_v28, %v725_v26  ;;  %v1202_v35 = vpack.c.bf16 %v742_v29, %v741_v27  ;;  %v1282_v36 = vadd.f32 %v1281_v32, %v1280_v30  ;;  %v1330_v37 = vadd.f32 %v1329_v33, %v1328_v31  ;;  %v1283_v38 = vpop.f32.mrb[22].mxu0  ;;  %v1331_v39 = vpop.f32.mrb[22].mxu1 }
 0x125   : > { %v1284_v40 = vpop.f32.mrb[23].mxu0  ;;  %v1332_v41 = vpop.f32.mrb[23].mxu1 }
 0x126   : > { %1222 = vst [vmem:[%s1613_s8 + $0x20] sm:$0xff] %v1162_v34   ;;  %1230 = vst [vmem:[%s1613_s8 + $0x60] sm:$0xff] %v1202_v35   ;;  %v631_v42 = vadd.f32 %v1282_v36, %v1603_v50  ;;  %v695_v43 = vadd.f32 %v1330_v37, %v1603_v50  ;;  %v1285_v44 = vadd.f32 %v1284_v40, %v1283_v38 }
 0x127   : > { %v1333_v45 = vadd.f32 %v1332_v41, %v1331_v39 }
 0x128   : > { %v634_v46 = vadd.f32 %v1285_v44, %v1603_v50  ;;  %v727_v48 = vmax.f32 %v631_v42, 0.0  ;;  %v743_v49 = vmax.f32 %v695_v43, 0.0 }
 0x129   : > { %v698_v47 = vadd.f32 %v1333_v45, %v1603_v50 }
 0x12a   : > { %v728_v51 = vmax.f32 %v634_v46, 0.0  ;;  %v1286_v53 = vpop.f32.mrb[24].mxu0  ;;  %v1334_v54 = vpop.f32.mrb[24].mxu1 }
 0x12b   : > { %v744_v52 = vmax.f32 %v698_v47, 0.0  ;;  %v1287_v55 = vpop.f32.mrb[25].mxu0  ;;  %v1335_v56 = vpop.f32.mrb[25].mxu1 }
 0x12c   : > { %v1167_v57 = vpack.c.bf16 %v728_v51, %v727_v48  ;;  %v1288_v59 = vadd.f32 %v1287_v55, %v1286_v53  ;;  %v1336_v60 = vadd.f32 %v1335_v56, %v1334_v54  ;;  %v1289_v61 = vpop.f32.mrb[26].mxu0  ;;  %v1337_v62 = vpop.f32.mrb[26].mxu1 }
 0x12d   : > { %v1207_v58 = vpack.c.bf16 %v744_v52, %v743_v49  ;;  %v1290_v63 = vpop.f32.mrb[27].mxu0  ;;  %v1338_v0 = vpop.f32.mrb[27].mxu1 }
 0x12e   : > { %1223 = vst [vmem:[%s1613_s8 + $0x28] sm:$0xff] %v1167_v57   ;;  %v639_v1 = vadd.f32 %v1288_v59, %v1603_v50  ;;  %v703_v2 = vadd.f32 %v1336_v60, %v1603_v50  ;;  %v1291_v3 = vadd.f32 %v1290_v63, %v1289_v61  ;;  %v1339_v4 = vadd.f32 %v1338_v0, %v1337_v62 }
 0x12f   : > { %1231 = vst [vmem:[%s1613_s8 + $0x68] sm:$0xff] %v1207_v58  }
 0x130   : > { %v642_v5 = vadd.f32 %v1291_v3, %v1603_v50  ;;  %v706_v6 = vadd.f32 %v1339_v4, %v1603_v50  ;;  %v729_v7 = vmax.f32 %v639_v1, 0.0  ;;  %v745_v8 = vmax.f32 %v703_v2, 0.0 }
 0x132   : > { %v730_v9 = vmax.f32 %v642_v5, 0.0  ;;  %v746_v10 = vmax.f32 %v706_v6, 0.0  ;;  %v1292_v11 = vpop.f32.mrb[28].mxu0  ;;  %v1340_v12 = vpop.f32.mrb[28].mxu1 }
 0x133   : > { %v1293_v13 = vpop.f32.mrb[29].mxu0  ;;  %v1341_v14 = vpop.f32.mrb[29].mxu1 }
 0x134   : > { %v1172_v15 = vpack.c.bf16 %v730_v9, %v729_v7  ;;  %v1212_v16 = vpack.c.bf16 %v746_v10, %v745_v8  ;;  %v1294_v17 = vadd.f32 %v1293_v13, %v1292_v11  ;;  %v1342_v18 = vadd.f32 %v1341_v14, %v1340_v12  ;;  %v1295_v19 = vpop.f32.mrb[30].mxu0  ;;  %v1343_v20 = vpop.f32.mrb[30].mxu1 }
 0x135   : > { %v1296_v21 = vpop.f32.mrb[31].mxu0  ;;  %v1344_v22 = vpop.f32.mrb[31].mxu1 }
 0x136   : > { %1224 = vst [vmem:[%s1613_s8 + $0x30] sm:$0xff] %v1172_v15   ;;  %1232 = vst [vmem:[%s1613_s8 + $0x70] sm:$0xff] %v1212_v16   ;;  %v647_v23 = vadd.f32 %v1294_v17, %v1603_v50  ;;  %v711_v24 = vadd.f32 %v1342_v18, %v1603_v50  ;;  %v1297_v25 = vadd.f32 %v1296_v21, %v1295_v19 }
 0x137   : > { %v1345_v26 = vadd.f32 %v1344_v22, %v1343_v20 }
 0x138   : > { %v650_v27 = vadd.f32 %v1297_v25, %v1603_v50  ;;  %v731_v29 = vmax.f32 %v647_v23, 0.0  ;;  %v747_v30 = vmax.f32 %v711_v24, 0.0 }
 0x139   : > { %v714_v28 = vadd.f32 %v1345_v26, %v1603_v50 }
 0x13a   : > { %v732_v31 = vmax.f32 %v650_v27, 0.0 }
 0x13b   : > { %v748_v32 = vmax.f32 %v714_v28, 0.0 }
 0x13c   : > { %v1177_v33 = vpack.c.bf16 %v732_v31, %v731_v29 }
 0x13d   : > { %v1217_v34 = vpack.c.bf16 %v748_v32, %v747_v30 }
 0x13e   : > { %1225 = vst [vmem:[%s1613_s8 + $0x38] sm:$0xff] %v1177_v33  }
 0x13f   : > { %1233 = vst [vmem:[%s1613_s8 + $0x78] sm:$0xff] %v1217_v34  }
 0x140 PF: > { %s13_s14 = sadd.s32 1, %s1472_s14   ;;  %s1672_s12 = smov %s1468_s13 }
 0x141   : > { %p10_p5 = scmp.ge.s32.totalorder %s13_s14, 4   ;;  %s1673_s13 = smov %s1675_s15 }
 0x143   :  { %12 = sbr.rel (!%p10_p5) target bundleno = 2 (0x2), region = 68 }

</bundles_post_ra>
